<compile_context>
chip_gen: v7x
topology: tpu7x:2x2x1
jax: 0.10.0
libtpu: 0.0.40
codegen_flags: <defaults>
</compile_context>

<pallas_src>
import jax
import jax.numpy as jnp
from jax import lax
from jax.experimental import pallas as pl
from jax.experimental.pallas import tpu as pltpu

_SMOOTH_NR = 1e-5
_SMOOTH_DR = 1e-5
_LAMBDA_DICE = 0.85
_LAMBDA_CE = 0.15
_LANE = 128


def _make_dice_ce_kernel(C, ts, rows, ns2, needs_mask):
    """Builds the per-(batch, core-split, spatial-tile) reduction body.

    p_ref, y_ref : (1, C, ts, 128) input blocks (native NCHW layout).
    o_ref        : (1, 1, 4, C, 128) per-(batch, core) partial sums, resident
                   across the spatial (reduction) grid axis:
                     [0] sum sigmoid(p)*y   (dice intersection, ch 1..C-1)
                     [1] sum sigmoid(p)     (dice pred_o,       ch 1..C-1)
                     [2] sum y              (dice ground_o,     ch 1..C-1)
                     [3] row 0: sum over pixels of (lse - p[argmax(y)])
    """

    def kernel(p_ref, y_ref, o_ref):
        core = pl.program_id(1)
        s = pl.program_id(2)

        @pl.when(s == 0)
        def _():
            o_ref[...] = jnp.zeros_like(o_ref)

        p = p_ref[0].astype(jnp.float32)        # (C, ts, 128)
        y = y_ref[0].astype(jnp.float32)        # (C, ts, 128)

        if needs_mask:
            # Tail / out-of-range tiles contribute zero.
            row_start = (core * ns2 + s) * ts
            r = lax.broadcasted_iota(jnp.int32, (ts, _LANE), 0)
            fmask = ((row_start + r) < rows).astype(jnp.float32)   # (ts, 128)

        # ---------- dice partials (sigmoid, foreground channels only) -------
        pf = p[1:]                                    # (C-1, ts, 128)
        yf = y[1:]
        sig = 0.5 * (jnp.tanh(0.5 * pf) + 1.0)        # single EUP op / element
        if needs_mask:
            sig = sig * fmask[None]
            yf_m = yf * fmask[None]
        else:
            yf_m = yf
        inter_t = jnp.sum(sig * yf, axis=1)           # (C-1, 128)
        pred_t = jnp.sum(sig, axis=1)                 # (C-1, 128)
        gt_t = jnp.sum(yf_m, axis=1)                  # (C-1, 128)

        # ---------- CE partial: per-pixel lse - p[argmax_c(y)] --------------
        m = jnp.max(p, axis=0)                                      # (ts, 128)
        lse = m + jnp.log(jnp.sum(jnp.exp(p - m[None]), axis=0))    # (ts, 128)
        ch = lax.broadcasted_iota(jnp.int32, p.shape, 0)
        ymax = jnp.max(y, axis=0)                                   # (ts, 128)
        cand = jnp.where(y == ymax[None], ch, C)                    # first occurrence
        amax = jnp.min(cand, axis=0)                                # (ts, 128)
        p_sel = jnp.sum(jnp.where(ch == amax[None], p, 0.0), axis=0)
        ce_pix = lse - p_sel                                        # (ts, 128)
        if needs_mask:
            ce_pix = ce_pix * fmask
        ce_t = jnp.sum(ce_pix, axis=0, keepdims=True)               # (1, 128)

        o_ref[0, 0, 0, 1:, :] += inter_t
        o_ref[0, 0, 1, 1:, :] += pred_t
        o_ref[0, 0, 2, 1:, :] += gt_t
        o_ref[0, 0, 3, 0:1, :] += ce_t

    return kernel


def _pick_spatial_tile(rows, C, p_item, y_item,
                       target_bytes=4 << 20, vmem_budget=40 << 20):
    """Largest legal second-minor block dim: ~4 MiB per input block, multiple
    of 8 (tail tiles handled by in-kernel masking), shrunk until the
    double-buffered input blocks plus f32 temporaries fit the VMEM budget."""
    if rows < 8:
        return rows                                   # block == full axis (legal)
    in_row = C * _LANE * max(p_item, y_item)
    t = min((rows // 8) * 8, max(8, (target_bytes // max(in_row, 1) // 8) * 8))
    # per-row footprint: 2 pipeline buffers per input + ~7 f32 temporaries
    per_row = 2 * C * _LANE * (p_item + y_item) + 7 * C * _LANE * 4
    while t > 8 and t * per_row > vmem_budget:
        t -= 8
    return max(8, t)


def loss_flood(p, y):
    """DiceCELoss(include_background=False, sigmoid=True, reduction='mean',
    lambda_dice=0.85, lambda_ce=0.15, batch=True) on NCHW logits / target."""
    B, C, H, W = p.shape
    assert C > 1, "include_background=False requires at least 2 channels"
    HW = H * W
    # TODO(synk): pad+mask path for H*W not a multiple of 128.
    assert HW % _LANE == 0, "H*W must be a multiple of 128"
    rows = HW // _LANE
    N = B * HW

    ts = _pick_spatial_tile(rows, C, p.dtype.itemsize, y.dtype.itemsize)
    ns = pl.cdiv(rows, ts)            # number of real spatial tiles
    S = 2 if ns >= 2 else 1           # core-split of the reduction (v7x megacore)
    ns2 = pl.cdiv(ns, S)
    needs_mask = (S * ns2 * ts != rows)

    # Free, contiguous reshape -- no HBM transpose, no wrapper dtype cast.
    p4 = p.reshape(B, C, rows, _LANE)
    y4 = y.reshape(B, C, rows, _LANE)

    last_blk = ns - 1
    if S * ns2 > ns:
        def in_map(b, c, s):
            return (b, 0, jnp.minimum(c * ns2 + s, last_blk), 0)
    else:
        def in_map(b, c, s):
            return (b, 0, c * ns2 + s, 0)

    out_map = lambda b, c, s: (b, c, 0, 0, 0)

    # VMEM estimate: 2 pipeline buffers per input (each in its own dtype),
    # ~7 f32 temporaries per block, resident output block, small headroom.
    blk_f32 = C * ts * _LANE * 4
    est = (2 * C * ts * _LANE * (p.dtype.itemsize + y.dtype.itemsize)
           + 7 * blk_f32 + 2 * 4 * C * _LANE * 4 + (2 << 20))
    vmem_limit = int(min(48 << 20, max(16 << 20, est)))

    kernel = _make_dice_ce_kernel(C, ts, rows, ns2, needs_mask)

    partials = pl.pallas_call(
        kernel,
        out_shape=jax.ShapeDtypeStruct((B, S, 4, C, _LANE), jnp.float32),
        grid=(B, S, ns2),
        in_specs=[
            pl.BlockSpec((1, C, ts, _LANE), in_map),
            pl.BlockSpec((1, C, ts, _LANE), in_map),
        ],
        out_specs=pl.BlockSpec((1, 1, 4, C, _LANE), out_map),
        compiler_params=pltpu.CompilerParams(
            dimension_semantics=("parallel", "parallel", "arbitrary"),
            vmem_limit_bytes=vmem_limit,
        ),
    )(p4, y4)

    # Tiny final combine (a few dozen flops) in plain JAX.
    sums = jnp.sum(partials, axis=(0, 1, 4))          # (4, C): batch+core+lanes
    inter, pred_o, gt_o = sums[0, 1:], sums[1, 1:], sums[2, 1:]
    f = 1.0 - (2.0 * inter + _SMOOTH_NR) / (gt_o + pred_o + _SMOOTH_DR)
    dice = jnp.mean(f)                                # include_background=False
    ce = sums[3, 0] / jnp.float32(N)
    return _LAMBDA_DICE * dice + _LAMBDA_CE * ce


def _loss_flood_ref(p, y):
    """Pure-JAX reference with identical semantics (sanity check)."""
    p = p.astype(jnp.float32)
    y = y.astype(jnp.float32)
    C = p.shape[1]
    # dice
    sig = jax.nn.sigmoid(p)[:, 1:]
    yt = y[:, 1:]
    red = (0, 2, 3)
    inter = jnp.sum(sig * yt, axis=red)
    denom = jnp.sum(yt, axis=red) + jnp.sum(sig, axis=red)
    dice = jnp.mean(1.0 - (2.0 * inter + _SMOOTH_NR) / (denom + _SMOOTH_DR))
    # ce
    tgt = jnp.argmax(y, axis=1)
    logsm = jax.nn.log_softmax(p, axis=1)
    oh = jax.nn.one_hot(tgt, C, axis=1)
    ce = -jnp.mean(jnp.sum(oh * logsm, axis=1))
    return _LAMBDA_DICE * dice + _LAMBDA_CE * ce


if __name__ == "__main__":
    key = jax.random.PRNGKey(0)
    kp, ky = jax.random.split(key)
    B, C, H, W = 2, 4, 16, 16

    # logits
    p = jax.random.normal(kp, (B, C, H, W), dtype=jnp.float32)
    # one-hot target in NCHW
    labels = jax.random.randint(ky, (B, H, W), 0, C)
    y = jnp.transpose(jax.nn.one_hot(labels, C, dtype=jnp.float32), (0, 3, 1, 2))

    out = loss_flood(p, y)
    out = jax.block_until_ready(out)

    ref = _loss_flood_ref(p, y)
    assert jnp.allclose(out, ref, rtol=1e-5, atol=1e-5), (out, ref)

    print("KERNEL_OK")
</pallas_src>

<mosaic_0001>
module attributes {stable_mosaic.version = 11 : i64} {
  func.func @kernel(%arg0: i32, %arg1: i32, %arg2: i32, %arg3: memref<1x4x2x128xf32, #tpu.memory_space<vmem>>, %arg4: memref<1x4x2x128xf32, #tpu.memory_space<vmem>>, %arg5: memref<1x1x4x4x128xf32, #tpu.memory_space<vmem>>) attributes {dimension_semantics = [#tpu.dimension_semantics<parallel>, #tpu.dimension_semantics<parallel>, #tpu.dimension_semantics<arbitrary>], iteration_bounds = array<i64: 2, 1, 1>, scalar_prefetch = 0 : i64, scratch_operands = 0 : i64, tpu.core_type = #tpu.core_type<tc>, window_params = [{transform_indices = @transform_0, window_bounds = array<i64: 1, 4, 2, 128>}, {transform_indices = @transform_1, window_bounds = array<i64: 1, 4, 2, 128>}, {transform_indices = @transform_2, window_bounds = array<i64: 1, 1, 4, 4, 128>}]} {
    %c0_i32 = arith.constant 0 : i32
    %0 = arith.cmpi eq, %arg2, %c0_i32 : i32
    %1 = arith.extui %0 : i1 to i32
    %c0_i32_0 = arith.constant 0 : i32
    %2 = arith.cmpi ne, %1, %c0_i32_0 : i32
    scf.if %2 {
      %cst_57 = arith.constant 0.000000e+00 : f32
      %69 = vector.broadcast %cst_57 : f32 to vector<1x1x4x4x128xf32>
      %c0_58 = arith.constant 0 : index
      %c0_59 = arith.constant 0 : index
      %c0_60 = arith.constant 0 : index
      %c0_61 = arith.constant 0 : index
      %c0_62 = arith.constant 0 : index
      %70 = vector.load %arg5[%c0_58, %c0_59, %c0_60, %c0_61, %c0_62] : memref<1x1x4x4x128xf32, #tpu.memory_space<vmem>>, vector<1x1x4x4x128xf32>
      tpu.vector_store %arg5[%c0_58, %c0_59, %c0_60, %c0_61, %c0_62], %69 {strides = array<i32>} : memref<1x1x4x4x128xf32, #tpu.memory_space<vmem>>, vector<1x1x4x4x128xf32>,
    } else {
    }
    %c0 = arith.constant 0 : index
    %c0_1 = arith.constant 0 : index
    %c0_2 = arith.constant 0 : index
    %c0_3 = arith.constant 0 : index
    %3 = vector.load %arg3[%c0, %c0_1, %c0_2, %c0_3] : memref<1x4x2x128xf32, #tpu.memory_space<vmem>>, vector<1x4x2x128xf32>
    %4 = vector.shape_cast %3 : vector<1x4x2x128xf32> to vector<4x2x128xf32>
    %c0_4 = arith.constant 0 : index
    %c0_5 = arith.constant 0 : index
    %c0_6 = arith.constant 0 : index
    %c0_7 = arith.constant 0 : index
    %5 = vector.load %arg4[%c0_4, %c0_5, %c0_6, %c0_7] : memref<1x4x2x128xf32, #tpu.memory_space<vmem>>, vector<1x4x2x128xf32>
    %6 = vector.shape_cast %5 : vector<1x4x2x128xf32> to vector<4x2x128xf32>
    %7 = vector.extract_strided_slice %4 {offsets = [1, 0, 0], sizes = [3, 2, 128], strides = [1, 1, 1]} : vector<4x2x128xf32> to vector<3x2x128xf32>
    %8 = vector.extract_strided_slice %6 {offsets = [1, 0, 0], sizes = [3, 2, 128], strides = [1, 1, 1]} : vector<4x2x128xf32> to vector<3x2x128xf32>
    %cst = arith.constant 5.000000e-01 : f32
    %9 = vector.broadcast %cst : f32 to vector<3x2x128xf32>
    %10 = arith.mulf %9, %7 : vector<3x2x128xf32>
    %11 = math.tanh %10 : vector<3x2x128xf32>
    %cst_8 = arith.constant 1.000000e+00 : f32
    %12 = vector.broadcast %cst_8 : f32 to vector<3x2x128xf32>
    %13 = arith.addf %11, %12 : vector<3x2x128xf32>
    %cst_9 = arith.constant 5.000000e-01 : f32
    %14 = vector.broadcast %cst_9 : f32 to vector<3x2x128xf32>
    %15 = arith.mulf %14, %13 : vector<3x2x128xf32>
    %16 = arith.mulf %15, %8 : vector<3x2x128xf32>
    %cst_10 = arith.constant dense<0.000000e+00> : vector<3x128xf32>
    %17 = vector.multi_reduction <add>, %16, %cst_10 [1] : vector<3x2x128xf32> to vector<3x128xf32>
    %cst_11 = arith.constant dense<0.000000e+00> : vector<3x128xf32>
    %18 = vector.multi_reduction <add>, %15, %cst_11 [1] : vector<3x2x128xf32> to vector<3x128xf32>
    %cst_12 = arith.constant dense<0.000000e+00> : vector<3x128xf32>
    %19 = vector.multi_reduction <add>, %8, %cst_12 [1] : vector<3x2x128xf32> to vector<3x128xf32>
    %cst_13 = arith.constant dense<0xFF800000> : vector<2x128xf32>
    %20 = vector.multi_reduction <maximumf>, %4, %cst_13 [0] : vector<4x2x128xf32> to vector<2x128xf32>
    %21 = vector.shape_cast %20 : vector<2x128xf32> to vector<1x2x128xf32>
    %22 = vector.broadcast %21 : vector<1x2x128xf32> to vector<4x2x128xf32>
    %23 = arith.subf %4, %22 : vector<4x2x128xf32>
    %24 = math.exp %23 : vector<4x2x128xf32>
    %cst_14 = arith.constant dense<0.000000e+00> : vector<2x128xf32>
    %25 = vector.multi_reduction <add>, %24, %cst_14 [0] : vector<4x2x128xf32> to vector<2x128xf32>
    %26 = math.log %25 : vector<2x128xf32>
    %27 = arith.addf %20, %26 : vector<2x128xf32>
    %28 = tpu.iota {dimensions = array<i32: 0>} : vector<4x2x128xi32>
    %cst_15 = arith.constant dense<0xFF800000> : vector<2x128xf32>
    %29 = vector.multi_reduction <maximumf>, %6, %cst_15 [0] : vector<4x2x128xf32> to vector<2x128xf32>
    %30 = vector.shape_cast %29 : vector<2x128xf32> to vector<1x2x128xf32>
    %31 = vector.broadcast %30 : vector<1x2x128xf32> to vector<4x2x128xf32>
    %32 = arith.cmpf oeq, %6, %31 : vector<4x2x128xf32>
    %c4_i32 = arith.constant 4 : i32
    %33 = vector.broadcast %c4_i32 : i32 to vector<4x2x128xi32>
    %34 = arith.select %32, %28, %33 : vector<4x2x128xi1>, vector<4x2x128xi32>
    %cst_16 = arith.constant dense<2147483647> : vector<2x128xi32>
    %35 = vector.multi_reduction <minsi>, %34, %cst_16 [0] : vector<4x2x128xi32> to vector<2x128xi32>
    %36 = vector.shape_cast %35 : vector<2x128xi32> to vector<1x2x128xi32>
    %37 = vector.broadcast %36 : vector<1x2x128xi32> to vector<4x2x128xi32>
    %38 = arith.cmpi eq, %28, %37 : vector<4x2x128xi32>
    %cst_17 = arith.constant 0.000000e+00 : f32
    %39 = vector.broadcast %cst_17 : f32 to vector<4x2x128xf32>
    %40 = arith.select %38, %4, %39 : vector<4x2x128xi1>, vector<4x2x128xf32>
    %cst_18 = arith.constant dense<0.000000e+00> : vector<2x128xf32>
    %41 = vector.multi_reduction <add>, %40, %cst_18 [0] : vector<4x2x128xf32> to vector<2x128xf32>
    %42 = arith.subf %27, %41 : vector<2x128xf32>
    %cst_19 = arith.constant dense<0.000000e+00> : vector<128xf32>
    %43 = vector.multi_reduction <add>, %42, %cst_19 [0] : vector<2x128xf32> to vector<128xf32>
    %44 = vector.shape_cast %43 : vector<128xf32> to vector<1x128xf32>
    %c0_20 = arith.constant 0 : index
    %c0_21 = arith.constant 0 : index
    %c0_22 = arith.constant 0 : index
    %c1 = arith.constant 1 : index
    %c0_23 = arith.constant 0 : index
    %45 = vector.load %arg5[%c0_20, %c0_21, %c0_22, %c1, %c0_23] : memref<1x1x4x4x128xf32, #tpu.memory_space<vmem>>, vector<1x1x1x3x128xf32>
    %46 = vector.shape_cast %45 : vector<1x1x1x3x128xf32> to vector<3x128xf32>
    %47 = arith.addf %46, %17 : vector<3x128xf32>
    %c0_24 = arith.constant 0 : index
    %c0_25 = arith.constant 0 : index
    %c0_26 = arith.constant 0 : index
    %c1_27 = arith.constant 1 : index
    %c0_28 = arith.constant 0 : index
    %48 = vector.load %arg5[%c0_24, %c0_25, %c0_26, %c1_27, %c0_28] : memref<1x1x4x4x128xf32, #tpu.memory_space<vmem>>, vector<1x1x1x3x128xf32>
    %49 = vector.shape_cast %48 : vector<1x1x1x3x128xf32> to vector<3x128xf32>
    %50 = vector.shape_cast %47 : vector<3x128xf32> to vector<1x1x1x3x128xf32>
    tpu.vector_store %arg5[%c0_24, %c0_25, %c0_26, %c1_27, %c0_28], %50 {strides = array<i32>} : memref<1x1x4x4x128xf32, #tpu.memory_space<vmem>>, vector<1x1x1x3x128xf32>,
    %c0_29 = arith.constant 0 : index
    %c0_30 = arith.constant 0 : index
    %c1_31 = arith.constant 1 : index
    %c1_32 = arith.constant 1 : index
    %c0_33 = arith.constant 0 : index
    %51 = vector.load %arg5[%c0_29, %c0_30, %c1_31, %c1_32, %c0_33] : memref<1x1x4x4x128xf32, #tpu.memory_space<vmem>>, vector<1x1x1x3x128xf32>
    %52 = vector.shape_cast %51 : vector<1x1x1x3x128xf32> to vector<3x128xf32>
    %53 = arith.addf %52, %18 : vector<3x128xf32>
    %c0_34 = arith.constant 0 : index
    %c0_35 = arith.constant 0 : index
    %c1_36 = arith.constant 1 : index
    %c1_37 = arith.constant 1 : index
    %c0_38 = arith.constant 0 : index
    %54 = vector.load %arg5[%c0_34, %c0_35, %c1_36, %c1_37, %c0_38] : memref<1x1x4x4x128xf32, #tpu.memory_space<vmem>>, vector<1x1x1x3x128xf32>
    %55 = vector.shape_cast %54 : vector<1x1x1x3x128xf32> to vector<3x128xf32>
    %56 = vector.shape_cast %53 : vector<3x128xf32> to vector<1x1x1x3x128xf32>
    tpu.vector_store %arg5[%c0_34, %c0_35, %c1_36, %c1_37, %c0_38], %56 {strides = array<i32>} : memref<1x1x4x4x128xf32, #tpu.memory_space<vmem>>, vector<1x1x1x3x128xf32>,
    %c0_39 = arith.constant 0 : index
    %c0_40 = arith.constant 0 : index
    %c2 = arith.constant 2 : index
    %c1_41 = arith.constant 1 : index
    %c0_42 = arith.constant 0 : index
    %57 = vector.load %arg5[%c0_39, %c0_40, %c2, %c1_41, %c0_42] : memref<1x1x4x4x128xf32, #tpu.memory_space<vmem>>, vector<1x1x1x3x128xf32>
    %58 = vector.shape_cast %57 : vector<1x1x1x3x128xf32> to vector<3x128xf32>
    %59 = arith.addf %58, %19 : vector<3x128xf32>
    %c0_43 = arith.constant 0 : index
    %c0_44 = arith.constant 0 : index
    %c2_45 = arith.constant 2 : index
    %c1_46 = arith.constant 1 : index
    %c0_47 = arith.constant 0 : index
    %60 = vector.load %arg5[%c0_43, %c0_44, %c2_45, %c1_46, %c0_47] : memref<1x1x4x4x128xf32, #tpu.memory_space<vmem>>, vector<1x1x1x3x128xf32>
    %61 = vector.shape_cast %60 : vector<1x1x1x3x128xf32> to vector<3x128xf32>
    %62 = vector.shape_cast %59 : vector<3x128xf32> to vector<1x1x1x3x128xf32>
    tpu.vector_store %arg5[%c0_43, %c0_44, %c2_45, %c1_46, %c0_47], %62 {strides = array<i32>} : memref<1x1x4x4x128xf32, #tpu.memory_space<vmem>>, vector<1x1x1x3x128xf32>,
    %c0_48 = arith.constant 0 : index
    %c0_49 = arith.constant 0 : index
    %c3 = arith.constant 3 : index
    %c0_50 = arith.constant 0 : index
    %c0_51 = arith.constant 0 : index
    %63 = vector.load %arg5[%c0_48, %c0_49, %c3, %c0_50, %c0_51] : memref<1x1x4x4x128xf32, #tpu.memory_space<vmem>>, vector<1x1x1x1x128xf32>
    %64 = vector.shape_cast %63 : vector<1x1x1x1x128xf32> to vector<1x128xf32>
    %65 = arith.addf %64, %44 : vector<1x128xf32>
    %c0_52 = arith.constant 0 : index
    %c0_53 = arith.constant 0 : index
    %c3_54 = arith.constant 3 : index
    %c0_55 = arith.constant 0 : index
    %c0_56 = arith.constant 0 : index
    %66 = vector.load %arg5[%c0_52, %c0_53, %c3_54, %c0_55, %c0_56] : memref<1x1x4x4x128xf32, #tpu.memory_space<vmem>>, vector<1x1x1x1x128xf32>
    %67 = vector.shape_cast %66 : vector<1x1x1x1x128xf32> to vector<1x128xf32>
    %68 = vector.shape_cast %65 : vector<1x128xf32> to vector<1x1x1x1x128xf32>
    tpu.vector_store %arg5[%c0_52, %c0_53, %c3_54, %c0_55, %c0_56], %68 {strides = array<i32>} : memref<1x1x4x4x128xf32, #tpu.memory_space<vmem>>, vector<1x1x1x1x128xf32>,
    return
  }
  func.func @transform_0(%arg0: i32, %arg1: i32, %arg2: i32) -> (i32, i32, i32, i32) {
    %c1_i32 = arith.constant 1 : i32
    %0 = arith.muli %arg1, %c1_i32 : i32
    %1 = arith.addi %0, %arg2 : i32
    %c0_i32 = arith.constant 0 : i32
    %c0_i32_0 = arith.constant 0 : i32
    %c0_i32_1 = arith.constant 0 : i32
    return %arg0, %c0_i32, %1, %c0_i32_0 : i32, i32, i32, i32
  }
  func.func @transform_1(%arg0: i32, %arg1: i32, %arg2: i32) -> (i32, i32, i32, i32) {
    %c1_i32 = arith.constant 1 : i32
    %0 = arith.muli %arg1, %c1_i32 : i32
    %1 = arith.addi %0, %arg2 : i32
    %c0_i32 = arith.constant 0 : i32
    %c0_i32_0 = arith.constant 0 : i32
    %c0_i32_1 = arith.constant 0 : i32
    return %arg0, %c0_i32, %1, %c0_i32_0 : i32, i32, i32, i32
  }
  func.func @transform_2(%arg0: i32, %arg1: i32, %arg2: i32) -> (i32, i32, i32, i32, i32) {
    %c0_i32 = arith.constant 0 : i32
    %c0_i32_0 = arith.constant 0 : i32
    %c0_i32_1 = arith.constant 0 : i32
    %c0_i32_2 = arith.constant 0 : i32
    return %arg0, %arg1, %c0_i32, %c0_i32_0, %c0_i32_1 : i32, i32, i32, i32, i32
  }
}

</mosaic_0001>

<bundles_post_ra>
// kernel: tpu_custom_call.1
= control target key start
LH: loop header
LB: loop body
LE: loop exit
PB: predicated region body
PF: predicated region fallthrough
CT: control target
= control target key end

     0   :  { %7 = vsyncpa [#allocation3], 0  ;;  %s1225_s0 = inlined_call_operand.hbm [shape: f32[2,4,2,128], index: 0, kind: input, shape index: {}]   ;;  %s1226_s1 = inlined_call_operand.hbm [shape: f32[2,4,2,128], index: 1, kind: input, shape index: {}]   ;;  %s1227_s2 = inlined_call_operand.hbm [shape: f32[2,1,4,4,128], index: 2, kind: output, shape index: {}]  }
   0x1   :  { %9 = vsyncpa [#allocation3 + $0x1], 0 }
   0x2   :  { %10 = vsyncpa [#allocation6], 0 }
   0x3   :  { %12 = vsyncpa [#allocation6 + $0x1], 0 }
   0x4   :  { %13 = vsyncpa [#allocation4], 0 }
   0x5   :  { %15 = vsyncpa [#allocation4 + $0x1], 0  ;;  %s865_s9 = smov 0   ;;  %s867_s10 = smov 0  }
   0x6   :  { %s869_s11 = smov 0   ;;  %s871_s12 = smov 0  }
   0x7   :  { %s873_s13 = smov 0   ;;  %s875_s14 = smov 0  }
   0x8 LB: > { %s576_s15 = sadd.s32 4294967295, %s839_s14   ;;  %s577_s16 = sadd.s32 4294967294, %s839_s14   ;;  %s839_s14 = sphi %s875_s14, %s21_s14   ;;  %s835_s13 = sphi %s873_s13, %s1245_s13   ;;  %s831_s12 = sphi %s871_s12, %s1244_s12   ;;  %s827_s11 = sphi %s869_s11, %s1243_s11   ;;  %s823_s10 = sphi %s867_s10, %s1242_s10   ;;  %s819_s9 = sphi %s865_s9, %s1241_s9  }
   0x9   : > { %s40_s17 = sadd.s32 1, %s835_s13  ;;  %s51_s18 = sadd.s32 1, %s827_s11 }
   0xa   : > { %p42_p0 = scmp.ge.s32.totalorder %s40_s17, 2  ;;  %p58_p1 = scmp.ne.s32.totalorder %s827_s11, %s823_s10 }
   0xb   : > { %p59_p2 = scmp.eq.s32.totalorder %s839_s14, 0  ;;  %p64_p3 = scmp.ne.s32.totalorder %s823_s10, %s819_s9 }
   0xc   : > { %s1247_s17 = smov (%p42_p0, %s40_s17), 0  ;;  %p65_p5 = scmp.eq.s32.totalorder %s576_s15, 0 }
   0xd   : > { %p906_p4 = por %p59_p2, %p58_p1  ;;  %s46_s20 = ssub.s32 %s835_s13, %s1247_s17 }
   0xe   : > { %p120_p6 = scmp.eq.s32.totalorder %s576_s15, 1  ;;  %p49_p7 = scmp.eq.s32.totalorder %s46_s20, 0 }
   0xf   : > { %p912_p8 = por %p65_p5, %p64_p3  ;;  %p126_p10 = scmp.eq.s32.totalorder %s577_s16, 1 }
  0x10   : > { %p916_p9 = por %p120_p6, %p58_p1  ;;  %p621_p13 = scmp.lt.s32.totalorder %s839_s14, 2 }
  0x11   : > { %s1231_s21 = scalar_select %p912_p8, 1, 0 }
  0x12   : > { %s1232_s22 = scalar_select %p916_p9, 1, 0 }
  0x13   : > { %s921_s23 = scalar_select %p49_p7, %s827_s11, %s51_s18  }
  0x14   : > { %p923_p11 = por %p126_p10, %p64_p3  ;;  %s930_s25 = sand.u32 1, %s827_s11  }
  0x15   : > { %s580_s26 = sshll.u32 %s930_s25, 3  ;;  %s601_s27 = sshll.u32 %s835_s13, 7 }
  0x16   : > { %s1233_s24 = scalar_select %p923_p11, 1, 0 }
  0x17   : > { %s939_s30 = scalar_lea.hbm %s1225_s0, %s601_s27  ;;  %s150_s3 = scalar_lea.vmem [#allocation2], %s580_s26 }
  0x18   : > { %s159_s4 = sshll.u32 %s150_s3, 4  ;;  %p947_p0 = pnand %p621_p13, %p906_p4  ;;  %s943_s4 = int_to_ptr.vmem [resolvable:$true] %s159_s4 }
  0x19   : > { %s147_s6 = scalar_lea.sflag [#allocation3], %s930_s25  ;;  %s693_s7 = scalar_lea.hbm %s939_s30, 128 }
  0x1a   : > { %p694_p2 = scmp.ne.s32.totalorder %s939_s30, %s693_s7  ;;  %p695_p3 = pneg %p947_p0 }
  0x1b   : > { %s698_s16 = scalar_lea.hbm %s1225_s0, 256  ;;  %p699_p4 = scmp.lt.u32.totalorder %s939_s30, %s1225_s0 }
  0x1c   : > { %p696_p5 = pnand %p695_p3, %p694_p2  ;;  %p700_p7 = scmp.lt.u32.totalorder %s698_s16, %s693_s7 }
  0x1d   : > { %p702_p13 = scmp.lt.u32.totalorder %s693_s7, %s939_s30 }
  0x1e   : > { %p697_p6 = pneg %p696_p5  ;;  %p701_p10 = por %p700_p7, %p699_p4 }
  0x20   : > { %p703_p12 = por %p702_p13, %p701_p10 }
  0x22   : > { %p704_p1 = pnand %p703_p12, %p697_p6 }
  0x24   : > { %707 = shalt.err (!%p704_p1)
}
  0x25   : > { %s708_s20 = scalar_lea.vmem %s943_s4, 128  ;;  %s841_s28 = smov [#allocation2]  }
  0x26   : > { %p709_p2 = scmp.ne.s32.totalorder %s943_s4, %s708_s20  ;;  %s713_s29 = sshll.u32 %s841_s28, 4  ;;  %s714_s29 = int_to_ptr.vmem [resolvable:$false] %s713_s29 }
  0x27   : > { %s715_s3 = scalar_lea.vmem %s714_s29, 256  ;;  %p716_p9 = scmp.lt.s32.totalorder %s943_s4, %s714_s29 }
  0x28   : > { %p711_p5 = pnand %p709_p2, %p695_p3  ;;  %p717_p4 = scmp.lt.s32.totalorder %s715_s3, %s708_s20 }
  0x2a   : > { %p712_p11 = pneg %p711_p5  ;;  %p718_p7 = por %p717_p4, %p716_p9 }
  0x2c   : > { %p719_p10 = pnand %p718_p7, %p712_p11 }
  0x2e   : > { %722 = shalt.err (!%p719_p10)
}
  0x2f   : > { %s842_s7 = smov 32   ;;  %s843_s8 = smov 2  }
  0x30   : > { %613 = dma.hbm_to_vmem [thread:$0]  (!%p947_p0), %s939_s30, 128, %s943_s4, %s147_s6, %s842_s7, %s842_s7, %s843_s8  }
  0x31   : > { %p190_p9 = scmp.lt.s32.totalorder %s839_s14, 3  ;;  %s989_s18 = scalar_lea.hbm %s1226_s1, %s601_s27 }
  0x32   : > { %p1235_p11 = scmp.ge.s32.totalorder %s839_s14, 1  ;;  %s173_s20 = scalar_lea.vmem [#allocation5], %s580_s26 }
  0x33   : > { %s182_s28 = sshll.u32 %s173_s20, 4  ;;  %s170_s30 = scalar_lea.sflag [#allocation6], %s930_s25  ;;  %s999_s28 = int_to_ptr.vmem [resolvable:$true] %s182_s28 }
  0x34   : > { %p993_p12 = pnand %p1235_p11, %p190_p9  ;;  %s723_s4 = scalar_lea.hbm %s989_s18, 128 }
  0x35   : > { %p724_p1 = scmp.ne.s32.totalorder %s989_s18, %s723_s4  ;;  %s728_s29 = scalar_lea.hbm %s1226_s1, 256 }
  0x36   : > { %p729_p2 = scmp.lt.u32.totalorder %s989_s18, %s1226_s1  ;;  %p730_p5 = scmp.lt.u32.totalorder %s728_s29, %s723_s4 }
  0x37   : > { %p726_p6 = pnand %p724_p1, %p695_p3  ;;  %p732_p7 = scmp.lt.u32.totalorder %s723_s4, %s989_s18 }
  0x38   : > { %p731_p4 = por %p730_p5, %p729_p2 }
  0x39   : > { %p727_p13 = pneg %p726_p6 }
  0x3a   : > { %p733_p10 = por %p732_p7, %p731_p4 }
  0x3c   : > { %p734_p9 = pnand %p733_p10, %p727_p13 }
  0x3e   : > { %737 = shalt.err (!%p734_p9)
}
  0x3f   : > { %s738_s26 = scalar_lea.vmem %s999_s28, 128  ;;  %s844_s16 = smov [#allocation5]  }
  0x40   : > { %p739_p11 = scmp.ne.s32.totalorder %s999_s28, %s738_s26  ;;  %s743_s20 = sshll.u32 %s844_s16, 4  ;;  %s744_s20 = int_to_ptr.vmem [resolvable:$false] %s743_s20 }
  0x41   : > { %s745_s27 = scalar_lea.vmem %s744_s20, 256  ;;  %p746_p8 = scmp.lt.s32.totalorder %s999_s28, %s744_s20 }
  0x42   : > { %p741_p1 = pnand %p739_p11, %p695_p3  ;;  %p747_p2 = scmp.lt.s32.totalorder %s745_s27, %s738_s26 }
  0x44   : > { %p742_p6 = pneg %p741_p1  ;;  %p748_p5 = por %p747_p2, %p746_p8 }
  0x46   : > { %p749_p4 = pnand %p748_p5, %p742_p6 }
  0x48   : > { %752 = shalt.err (!%p749_p4)
}
  0x49   : > { %616 = dma.hbm_to_vmem [thread:$0]  (!%p947_p0), %s989_s18, 128, %s999_s28, %s170_s30, %s842_s7, %s842_s7, %s843_s8  }
  0x4a   : > { %194 = sbr.rel (%p993_p12) target bundleno = 175 (0xaf), region = 28  ;;  %s1033_s4 = sand.u32 (!%p993_p12), 1, %s823_s10  }
  0x4b   : > { %s587_s6 = sshll.u32 (!%p993_p12), %s1033_s4, 3  ;;  %s197_s29 = scalar_lea.sflag (!%p993_p12), [#allocation3], %s1033_s4 }
  0x4c   : > { %s1037_s5 = scalar_lea.vmem (!%p993_p12), [#allocation2], %s587_s6  ;;  %p1237_p8 = scmp.ne.s32.totalorder (!%p993_p12), %s1231_s21, 0 }
  0x51   : > { %806 = dma.done.wait (%p1237_p8), %s197_s29, 128  }
  0x52   : > { %808 = vsyncadd (%p1237_p8), %s197_s29, 4294967168  ;;  %s206_s25 = scalar_lea.sflag [#allocation6], %s1033_s4  ;;  %s209_s7 = scalar_lea.vmem [#allocation5], %s587_s6 }
  0x53   : > { %810 = dma.done.wait (%p1237_p8), %s206_s25, 128  }
  0x54   : > { %812 = vsyncadd (%p1237_p8), %s206_s25, 4294967168  ;;  %s589_s8 = sshll.u32 %s1033_s4, 4  ;;  %v845_v0 = vmov 0.0   ;;  %vm268_vm0 = vcmask 1041408   ;;  %v1056_v1 = vld [vmem:[%s1037_s5 + $0x2] sm:$0x3] }
  0x55   : > { %s1049_s18 = scalar_lea.vmem [#allocation7], %s589_s8  ;;  %v1059_v2 = vld [vmem:[%s1037_s5 + $0x4] sm:$0x3]  ;;  %v1062_v3 = vld [vmem:[%s1037_s5 + $0x6] sm:$0x3]  ;;  %v253_v8 = vmul.f32 0.5, %v1056_v1 }
  0x56   : > { %241 = vst [vmem:[%s1049_s18] sm:$0xf] %v845_v0  ;;  %242 = vst [vmem:[%s1049_s18 + $0x4] sm:$0xf] %v845_v0  ;;  %v249_v4 = vld [vmem:[%s209_s7] sm:$0x3]  ;;  %v254_v9 = vmul.f32 0.5, %v1059_v2 }
  0x57   : > { %243 = vst [vmem:[%s1049_s18 + $0x8] sm:$0xf] %v845_v0  ;;  %244 = vst [vmem:[%s1049_s18 + $0xc] sm:$0xf] %v845_v0  ;;  %v1064_v5 = vld [vmem:[%s209_s7 + $0x2] sm:$0x3]  ;;  %677 = vtanh.f32 %v253_v8 }
  0x58   : > { %v1066_v6 = vld [vmem:[%s209_s7 + $0x4] sm:$0x3]  ;;  %v1068_v7 = vld [vmem:[%s209_s7 + $0x6] sm:$0x3]  ;;  %v255_v10 = vmul.f32 0.5, %v1062_v3  ;;  %v335_v11 = vsel %vm268_vm0, %v1062_v3, -inf  ;;  %679 = vtanh.f32 %v254_v9 }
  0x59   : > { %v361_v12 = vsel %vm268_vm0, %v249_v4, -inf  ;;  %v362_v13 = vsel %vm268_vm0, %v1064_v5, -inf  ;;  %v363_v14 = vsel %vm268_vm0, %v1066_v6, -inf  ;;  %v364_v15 = vsel %vm268_vm0, %v1068_v7, -inf  ;;  %v1089_v22 = vld [vmem:[%s1037_s5] sm:$0x3] }
  0x5a   : > { %v365_v16 = vmax.f32 %v361_v12, %v362_v13  ;;  %v366_v17 = vmax.f32 %v363_v14, %v364_v15  ;;  %v311_v18 = vsel %vm268_vm0, %v1064_v5, 0.0  ;;  %v318_v20 = vsel %vm268_vm0, %v1066_v6, 0.0  ;;  %s603_s21 = sshll.u32 %s831_s12, 8  ;;  %s460_s19 = sshll.u32 %s1049_s18, 4  ;;  %s1175_s19 = int_to_ptr.vmem [resolvable:$true] %s460_s19 }
  0x5b   : > { %v312_v19 = vrot.slane %v311_v18, 4  ;;  %v325_v21 = vsel %vm268_vm0, %v1068_v7, 0.0  ;;  %681 = vtanh.f32 %v255_v10  ;;  %v319_v24 = vrot.slane %v318_v20, 4  ;;  %s1173_s3 = scalar_lea.hbm %s1227_s2, %s603_s21  ;;  %s445_s15 = scalar_lea.sflag [#allocation4], %s1033_s4 }
  0x5c   : > { %v367_v23 = vmax.f32 %v365_v16, %v366_v17  ;;  %v326_v25 = vrot.slane %v325_v21, 4  ;;  %vm413_vm1 = vcmask 1041409   ;;  %v332_v27 = vsel %vm268_vm0, %v1089_v22, -inf  ;;  %s753_s26 = scalar_lea.vmem %s1175_s19, 256  ;;  %p1238_p3 = scmp.ne.s32.totalorder %s1232_s22, 0 }
  0x5d   : > { %v313_v26 = vadd.f32 %v312_v19, %v311_v18  ;;  %v333_v28 = vsel %vm268_vm0, %v1056_v1, -inf  ;;  %v334_v29 = vsel %vm268_vm0, %v1059_v2, -inf  ;;  %vm415_vm5 = vcmask 1042434   ;;  %p754_p0 = scmp.ne.s32.totalorder %s1175_s19, %s753_s26  ;;  %s847_s12 = smov [#allocation7]  }
  0x5e   : > { %vm369_vm2 = vcmp.eq.f32.partialorder %v1064_v5, %v367_v23  ;;  %vm370_vm3 = vcmp.eq.f32.partialorder %v1066_v6, %v367_v23  ;;  %vm371_vm4 = vcmp.eq.f32.partialorder %v1068_v7, %v367_v23  ;;  %v320_v30 = vadd.f32 %v319_v24, %v318_v20  ;;  %s757_s16 = sshll.u32 %s847_s12, 4  ;;  %s758_s16 = int_to_ptr.vmem [resolvable:$false] %s757_s16 }
  0x5f   : > { %v846_v31 = vmov 4   ;;  %v314_v33 = vrot.slane %v313_v26, 2  ;;  %v327_v34 = vadd.f32 %v326_v25, %v325_v21  ;;  %v336_v35 = vmax.f32 %v332_v27, %v333_v28  ;;  %p755_p12 = pnand %p754_p0, %p1238_p3  ;;  %s759_s20 = scalar_lea.vmem %s758_s16, 512 }
  0x60   : > { %v375_v32 = vsel %vm371_vm4, 3, %v846_v31  ;;  %v321_v36 = vrot.slane %v320_v30, 2  ;;  %v337_v37 = vmax.f32 %v334_v29, %v335_v11  ;;  %vm368_vm6 = vcmp.eq.f32.partialorder %v249_v4, %v367_v23  ;;  %v592_v11 = vld [vmem:[%s1049_s18 + $0x9] sm:$0x7]  ;;  %p760_p7 = scmp.lt.s32.totalorder %s1175_s19, %s758_s16  ;;  %p761_p10 = scmp.lt.s32.totalorder %s759_s20, %s753_s26 }
  0x61   : > { %v373_v38 = vsel %vm369_vm2, 1, %v846_v31  ;;  %v315_v39 = vadd.f32 %v314_v33, %v313_v26  ;;  %v328_v40 = vrot.slane %v327_v34, 2  ;;  %v372_v41 = vsel %vm368_vm6, 0, %v846_v31  ;;  %v678_v51 = vpop.eup %677  ;;  %p756_p13 = pneg %p755_p12 }
  0x62   : > { %v374_v42 = vsel %vm370_vm3, 2, %v846_v31  ;;  %v322_v43 = vadd.f32 %v321_v36, %v320_v30  ;;  %v1102_v44 = vmax.f32 %v336_v35, %v337_v37  ;;  %v1105_v45 = vsel %vm268_vm0, %v372_v41, 2147483647  ;;  %v680_v56 = vpop.eup %679  ;;  %p762_p9 = por %p761_p10, %p760_p7 }
  0x63   : > { %v1108_v46 = vsel %vm268_vm0, %v373_v38, 2147483647  ;;  %v316_v47 = vrot.slane %v315_v39, 1  ;;  %v329_v48 = vadd.f32 %v328_v40, %v327_v34  ;;  %v1111_v49 = vsel %vm268_vm0, %v374_v42, 2147483647 }
  0x64   : > { %v1114_v50 = vsel %vm268_vm0, %v375_v32, 2147483647  ;;  %v323_v52 = vrot.slane %v322_v43, 1  ;;  %v339_v53 = vsub.f32 %v1089_v22, %v1102_v44  ;;  %v340_v54 = vsub.f32 %v1056_v1, %v1102_v44  ;;  %p763_p11 = pnand %p762_p9, %p756_p13 }
  0x65   : > { %v341_v55 = vsub.f32 %v1059_v2, %v1102_v44  ;;  %v259_v57 = vadd.f32 1.0, %v678_v51  ;;  %v317_v58 = vadd.f32 %v316_v47, %v315_v39  ;;  %v330_v59 = vrot.slane %v329_v48, 1  ;;  %v682_v61 = vpop.eup %681 }
  0x66   : > { %v342_v60 = vsub.f32 %v1062_v3, %v1102_v44  ;;  %v260_v62 = vadd.f32 1.0, %v680_v56  ;;  %v324_v63 = vadd.f32 %v323_v52, %v322_v43  ;;  %v343_v0 = vmul.f32 1.442695, %v339_v53 }
  0x67   : > { %v345_v4 = vmul.f32 1.442695, %v340_v54  ;;  %v261_v8 = vadd.f32 1.0, %v682_v61  ;;  %v262_v9 = vmul.f32 0.5, %v259_v57  ;;  %v331_v10 = vadd.f32 %v330_v59, %v329_v48 }
  0x68   : > { %v347_v12 = vmul.f32 1.442695, %v341_v55  ;;  %v263_v13 = vmul.f32 0.5, %v260_v62  ;;  %v435_v14 = vsel %vm413_vm1, %v324_v63, %v317_v58  ;;  %683 = vpow2.f32 %v343_v0 }
  0x69   : > { %v349_v15 = vmul.f32 1.442695, %v342_v60  ;;  %v264_v16 = vmul.f32 0.5, %v261_v8  ;;  %v265_v17 = vmul.f32 %v262_v9, %v1064_v5  ;;  %v290_v18 = vsel %vm268_vm0, %v262_v9, 0.0 }
  0x6a   : > { %v436_v19 = vsel %vm415_vm5, %v331_v10, %v435_v14  ;;  %v266_v20 = vmul.f32 %v263_v13, %v1066_v6  ;;  %v291_v21 = vrot.slane %v290_v18, 4  ;;  %v297_v23 = vsel %vm268_vm0, %v263_v13, 0.0 }
  0x6b   : > { %v438_v24 = vadd.f32 %v592_v11, %v436_v19  ;;  %v267_v25 = vmul.f32 %v264_v16, %v1068_v7  ;;  %v269_v26 = vsel %vm268_vm0, %v265_v17, 0.0  ;;  %v298_v27 = vrot.slane %v297_v23, 4  ;;  %v590_v11 = vld [vmem:[%s1049_s18 + $0x5] sm:$0x7] }
  0x6c   : > { %v304_v28 = vsel %vm268_vm0, %v264_v16, 0.0  ;;  %v270_v29 = vrot.slane %v269_v26, 4  ;;  %v276_v5 = vsel %vm268_vm0, %v266_v20, 0.0  ;;  %v292_v30 = vadd.f32 %v291_v21, %v290_v18 }
  0x6d   : > { %v305_v31 = vrot.slane %v304_v28, 4  ;;  %593 = vst [vmem:[%s1049_s18 + $0x9] sm:$0x7] %v438_v24  ;;  %v277_v32 = vrot.slane %v276_v5, 4  ;;  %v283_v6 = vsel %vm268_vm0, %v267_v25, 0.0  ;;  %v299_v33 = vadd.f32 %v298_v27, %v297_v23 }
  0x6e   : > { %685 = vpow2.f32 %v345_v4  ;;  %v271_v34 = vadd.f32 %v270_v29, %v269_v26  ;;  %v284_v35 = vrot.slane %v283_v6, 4  ;;  %v293_v36 = vrot.slane %v292_v30, 2 }
  0x6f   : > { %v306_v7 = vadd.f32 %v305_v31, %v304_v28  ;;  %v278_v37 = vadd.f32 %v277_v32, %v276_v5  ;;  %v300_v38 = vrot.slane %v299_v33, 2  ;;  %687 = vpow2.f32 %v347_v12 }
  0x70   : > { %vm380_vm7 = vcmp.lt.s32.totalorder %v1105_v45, %v1108_v46  ;;  %v272_v39 = vrot.slane %v271_v34, 2  ;;  %v285_v40 = vadd.f32 %v284_v35, %v283_v6  ;;  %v294_v41 = vadd.f32 %v293_v36, %v292_v30 }
  0x71   : > { %v307_v42 = vrot.slane %v306_v7, 2  ;;  %v279_v43 = vrot.slane %v278_v37, 2  ;;  %v301_v47 = vadd.f32 %v300_v38, %v299_v33  ;;  %689 = vpow2.f32 %v349_v15  ;;  %v409_v15 = vld [vmem:[%s1049_s18 + $0x1] sm:$0x7] }
  0x72   : > { %v684_v48 = vpop.eup %683  ;;  %v273_v51 = vadd.f32 %v272_v39, %v271_v34  ;;  %v286_v52 = vrot.slane %v285_v40, 2  ;;  %v295_v53 = vrot.slane %v294_v41, 1  ;;  %v381_v57 = vsel %vm380_vm7, %v1105_v45, %v1108_v46 }
  0x73   : > { %v308_v54 = vadd.f32 %v307_v42, %v306_v7  ;;  %v280_v55 = vadd.f32 %v279_v43, %v278_v37  ;;  %v302_v56 = vrot.slane %v301_v47, 1  ;;  %vm382_vm8 = vcmp.lt.s32.totalorder %v1111_v49, %v1114_v50  ;;  %v594_v42 = vld [vmem:[%s1049_s18 + $0xc] sm:$0x1] }
  0x74   : > { %v274_v58 = vrot.slane %v273_v51, 1  ;;  %v287_v59 = vadd.f32 %v286_v52, %v285_v40  ;;  %v296_v60 = vadd.f32 %v295_v53, %v294_v41  ;;  %v351_v0 = vsel %vm268_vm0, %v684_v48, 0.0 }
  0x75   : > { %v309_v61 = vrot.slane %v308_v54, 1  ;;  %v281_v62 = vrot.slane %v280_v55, 1  ;;  %v303_v63 = vadd.f32 %v302_v56, %v301_v47  ;;  %v383_v4 = vsel %vm382_vm8, %v1111_v49, %v1114_v50 }
  0x76   : > { %v275_v8 = vadd.f32 %v274_v58, %v273_v51  ;;  %v288_v9 = vrot.slane %v287_v59, 1  ;;  %vm384_vm9 = vcmp.lt.s32.totalorder %v381_v57, %v383_v4 }
  0x77   : > { %v310_v10 = vadd.f32 %v309_v61, %v308_v54  ;;  %v282_v46 = vadd.f32 %v281_v62, %v280_v55  ;;  %v425_v12 = vsel %vm413_vm1, %v303_v63, %v296_v60  ;;  %v385_v13 = vsel %vm384_vm9, %v381_v57, %v383_v4 }
  0x78   : > { %v686_v45 = vpop.eup %685  ;;  %v289_v14 = vadd.f32 %v288_v9, %v287_v59  ;;  %vm386_vm10 = vcmp.eq.s32.totalorder %v385_v13, 0  ;;  %vm387_vm11 = vcmp.eq.s32.totalorder %v385_v13, 1  ;;  %vm388_vm12 = vcmp.eq.s32.totalorder %v385_v13, 2 }
  0x79   : > { %v426_v16 = vsel %vm415_vm5, %v310_v10, %v425_v12  ;;  %v352_v17 = vsel %vm268_vm0, %v686_v45, 0.0  ;;  %v688_v49 = vpop.eup %687  ;;  %v414_v50 = vsel %vm413_vm1, %v282_v46, %v275_v8  ;;  %v390_v27 = vsel %vm386_vm10, %v1089_v22, 0.0 }
  0x7a   : > { %v428_v18 = vadd.f32 %v590_v11, %v426_v16  ;;  %v353_v19 = vadd.f32 %v352_v17, %v351_v0  ;;  %v416_v20 = vsel %vm415_vm5, %v289_v14, %v414_v50  ;;  %v354_v21 = vsel %vm268_vm0, %v688_v49, 0.0 }
  0x7b   : > { %v690_v23 = vpop.eup %689  ;;  %v418_v24 = vadd.f32 %v416_v20, %v409_v15  ;;  %v391_v28 = vsel %vm387_vm11, %v1056_v1, 0.0  ;;  %v394_v5 = vsel %vm268_vm0, %v390_v27, 0.0  ;;  %v392_v31 = vsel %vm388_vm12, %v1059_v2, 0.0 }
  0x7c   : > { %591 = vst [vmem:[%s1049_s18 + $0x5] sm:$0x7] %v428_v18  ;;  %v355_v25 = vadd.f32 %v354_v21, %v353_v19  ;;  %v356_v26 = vsel %vm268_vm0, %v690_v23, 0.0  ;;  %v395_v30 = vsel %vm268_vm0, %v391_v28, 0.0  ;;  %vm389_vm13 = vcmp.eq.s32.totalorder %v385_v13, 3 }
  0x7d   : > { %419 = vst [vmem:[%s1049_s18 + $0x1] sm:$0x7] %v418_v24  ;;  %v396_v32 = vadd.f32 %v395_v30, %v394_v5  ;;  %v397_v6 = vsel %vm268_vm0, %v392_v31, 0.0  ;;  %v393_v22 = vsel %vm389_vm13, %v1062_v3, 0.0 }
  0x7e   : > { %v357_v29 = vadd.f32 %v356_v26, %v355_v25  ;;  %v399_v33 = vsel %vm268_vm0, %v393_v22, 0.0 }
  0x7f   : > { %v398_v1 = vadd.f32 %v397_v6, %v396_v32 }
  0x80   : > { %691 = vlog2.f32 %v357_v29 }
  0x81   : > { %v400_v36 = vadd.f32 %v399_v33, %v398_v1 }
  0x8a   : > { %v692_v34 = vpop.eup %691 }
  0x8b   : > { %v359_v35 = vmul.f32 0.6931472, %v692_v34 }
  0x8d   : > { %v360_v7 = vadd.f32 %v359_v35, %v1102_v44 }
  0x8f   : > { %v401_v2 = vsub.f32 %v360_v7, %v400_v36 }
  0x91   : > { %v402_v37 = vsel %vm268_vm0, %v401_v2, 0.0 }
  0x92   : > { %v403_v38 = vrot.slane %v402_v37, 4 }
  0x94   : > { %v404_v39 = vadd.f32 %v403_v38, %v402_v37 }
  0x96   : > { %v405_v40 = vrot.slane %v404_v39, 2 }
  0x98   : > { %v406_v41 = vadd.f32 %v405_v40, %v404_v39 }
  0x9a   : > { %v407_v3 = vrot.slane %v406_v41, 1 }
  0x9c   : > { %v408_v43 = vadd.f32 %v407_v3, %v406_v41 }
  0x9e   : > { %v442_v44 = vadd.f32 %v594_v42, %v408_v43 }
  0xa0   : > { %595 = vst [vmem:[%s1049_s18 + $0xc] sm:$0x1] %v442_v44 }
  0xa1   : > { %766 = shalt.err (!%p763_p11)
}
  0xa2   : > { %s767_s27 = scalar_lea.hbm %s1173_s3, 256  ;;  %s771_s5 = scalar_lea.hbm %s1227_s2, 512 }
  0xa3   : > { %p768_p1 = scmp.ne.s32.totalorder %s1173_s3, %s767_s27  ;;  %p772_p5 = scmp.lt.u32.totalorder %s1173_s3, %s1227_s2 }
  0xa4   : > { %p773_p4 = scmp.lt.u32.totalorder %s771_s5, %s767_s27  ;;  %p775_p0 = scmp.lt.u32.totalorder %s767_s27, %s1173_s3 }
  0xa5   : > { %p769_p6 = pnand %p768_p1, %p1238_p3 }
  0xa6   : > { %p774_p8 = por %p773_p4, %p772_p5 }
  0xa7   : > { %p770_p2 = pneg %p769_p6 }
  0xa8   : > { %p776_p12 = por %p775_p0, %p774_p8 }
  0xaa   : > { %p777_p13 = pnand %p776_p12, %p770_p2 }
  0xac   : > { %780 = shalt.err (!%p777_p13)
}
  0xad   : > { %s848_s8 = smov 64   ;;  %s849_s18 = smov 4  }
  0xae   : > { %608 = dma.vmem_to_hbm [thread:$0]  (%p1238_p3), %s1175_s19, 256, %s1173_s3, %s445_s15, %s848_s8, %s848_s8, %s849_s18  }
  0xaf PF: > { %s475_s21 = sand.u32 1, %s819_s9   ;;  %p1239_p7 = scmp.ne.s32.totalorder %s1233_s24, 0 }
  0xb0   : > { %p1240_p10 = scmp.ge.s32.totalorder %s839_s14, 2  ;;  %s476_s28 = scalar_lea.sflag [#allocation4], %s475_s21 }
  0xb2   : > { %p618_p9 = pnand %p1240_p10, %p1239_p7 }
  0xb4   : > { %814 = dma.done.wait (!%p618_p9), %s476_s28, 256  }
  0xb5   : > { %816 = vsyncadd (!%p618_p9), %s476_s28, 4294967040  ;;  %s21_s14 = sadd.s32 1, %s839_s14   ;;  %s1241_s9 = smov %s823_s10 }
  0xb6   : > { %p18_p11 = scmp.ge.s32.totalorder %s21_s14, 4   ;;  %s1242_s10 = smov %s827_s11 }
  0xb7   : > { %s1243_s11 = smov %s921_s23  ;;  %s1244_s12 = smov %s835_s13 }
  0xb8   : > { %s1245_s13 = smov %s1247_s17  ;;  %20 = sbr.rel (!%p18_p11) target bundleno = 8 (0x8), region = 93 }
  0xbf   :  { %481 = vsyncpa [#allocation3], 1 }
  0xc0   :  { %483 = vsyncpa [#allocation3 + $0x1], 1 }
  0xc1   :  { %484 = vsyncpa [#allocation6], 1 }
  0xc2   :  { %486 = vsyncpa [#allocation6 + $0x1], 1 }
  0xc3   :  { %487 = vsyncpa [#allocation4], 1 }
  0xc4   :  { %489 = vsyncpa [#allocation4 + $0x1], 1 }

</bundles_post_ra>
